<compile_context>
chip_gen: v7x
topology: tpu7x:2x2x1
jax: 0.10.0
libtpu: 0.0.40
codegen_flags: <defaults>
</compile_context>

<pallas_src>
import jax
import jax.numpy as jnp
from jax.experimental import pallas as pl
from jax.experimental.pallas import tpu as pltpu

LANE = 128  # lane width


def _round_up(n, m):
    return ((n + m - 1) // m) * m


def dqn_kernel(x_ref, w1_ref, b1_ref, w2_ref, b2_ref, w3_ref, b3_ref, o_ref):
    # Cast activations to bf16 in-kernel (VPU, hidden under MXU/DMA).
    x = x_ref[...].astype(jnp.bfloat16)
    # fc1 + ReLU (bf16 operands, f32 accumulate; K=S is padded internally by Mosaic)
    h1 = jnp.dot(x, w1_ref[...], preferred_element_type=jnp.float32)
    h1 = jnp.maximum(h1 + b1_ref[...], 0.0).astype(jnp.bfloat16)
    # fc2 + ReLU
    h2 = jnp.dot(h1, w2_ref[...], preferred_element_type=jnp.float32)
    h2 = jnp.maximum(h2 + b2_ref[...], 0.0).astype(jnp.bfloat16)
    # fc3 (no activation); lane-dense (128-wide) bf16 store
    out = jnp.dot(h2, w3_ref[...], preferred_element_type=jnp.float32)
    o_ref[...] = (out + b3_ref[...]).astype(o_ref.dtype)
    # TODO(synk): optionally fuse the downstream max/argmax over actions here so
    # the (B, 128) Q-slab never hits HBM (kept out to preserve the module's
    # forward semantics, which returns raw Q-values).


def prepare_params(params):
    """One-time conversion of PyTorch-convention params for the kernel:
    transpose to (in, out), cast matmul operands to bf16, pad only the output dim."""
    w1, b1 = params["w1"], params["b1"]   # (H, S), (H,)
    w2, b2 = params["w2"], params["b2"]   # (H, H), (H,)
    w3, b3 = params["w3"], params["b3"]   # (A, H), (A,)
    H, S = w1.shape
    A = w3.shape[0]
    A_pad = _round_up(A, LANE)
    # Resident-weight blocks rely on H being 128-aligned (it is the full array
    # dim for w2, but fc1's N and fc3's K want lane/sublane-friendly sizes).
    assert H % LANE == 0, "hidden_dim must be a multiple of 128 for this kernel"

    w1t = w1.T.astype(jnp.bfloat16)                       # (S, H) -- no lane padding of S
    w2t = w2.T.astype(jnp.bfloat16)                       # (H, H)
    w3t = jnp.zeros((H, A_pad), jnp.bfloat16).at[:, :A].set(w3.T.astype(jnp.bfloat16))
    b3p = jnp.zeros((1, A_pad), jnp.float32).at[:, :A].set(b3.astype(jnp.float32))

    return {
        "w1t": w1t, "b1": b1.astype(jnp.float32).reshape(1, H),
        "w2t": w2t, "b2": b2.astype(jnp.float32).reshape(1, H),
        "w3t": w3t, "b3": b3p,
        "S": S, "A": A, "H": H, "A_pad": A_pad,
    }


def _resident_spec(shape):
    """Full-array block that stays VMEM-resident across the batch grid."""
    zeros = (0,) * len(shape)
    return pl.BlockSpec(shape, lambda *_: zeros)


def dqn_forward(x, prep):
    """x: (B, state_dim) f32. prep: output of prepare_params(). Returns (B, A) f32."""
    B, S = x.shape
    A_pad, A = prep["A_pad"], prep["A"]
    assert S == prep["S"]

    # Batch tiling: up to 1024 rows -> one grid step (block == full array dims,
    # so any B is legal with no padding); larger batches -> 512-row tiles
    # (85%+ of HBM roofline per tiling sweep), weights stay VMEM-resident and
    # the batch axis is "parallel".
    # TODO(synk): on v7x, split moderate batches (B >= ~64) into >= 2 grid steps
    # so both TensorCores get work (gate on chip query; harmless to skip here).
    if B <= 1024:
        TB = B
        B_pad = B
        xp = x
    else:
        TB = 512
        B_pad = _round_up(B, TB)
        xp = x if B_pad == B else jnp.pad(x, ((0, B_pad - B), (0, 0)))

    grid = (B_pad // TB,)
    in_specs = [
        pl.BlockSpec((TB, S), lambda i: (i, 0)),   # x: blocked over batch, unpadded lanes
        _resident_spec(prep["w1t"].shape),
        _resident_spec(prep["b1"].shape),
        _resident_spec(prep["w2t"].shape),
        _resident_spec(prep["b2"].shape),
        _resident_spec(prep["w3t"].shape),
        _resident_spec(prep["b3"].shape),
    ]
    out_spec = pl.BlockSpec((TB, A_pad), lambda i: (i, 0))

    out_padded = pl.pallas_call(
        dqn_kernel,
        out_shape=jax.ShapeDtypeStruct((B_pad, A_pad), jnp.bfloat16),  # bf16 halves writeback
        grid=grid,
        in_specs=in_specs,
        out_specs=out_spec,
        compiler_params=pltpu.CompilerParams(dimension_semantics=("parallel",)),
    )(xp, prep["w1t"], prep["b1"], prep["w2t"], prep["b2"], prep["w3t"], prep["b3"])

    # Tiny (B, A) slice; cast back to f32 to preserve the module's output dtype.
    return out_padded[:B, :A].astype(jnp.float32)


def init_params(key, state_dim, action_dim, hidden_dim=128):
    """Deterministic init mimicking nn.Linear's U(-1/sqrt(fan_in), 1/sqrt(fan_in))."""
    ks = jax.random.split(key, 6)

    def linear(kw, kb, fan_in, fan_out):
        bound = 1.0 / jnp.sqrt(jnp.float32(fan_in))
        w = jax.random.uniform(kw, (fan_out, fan_in), jnp.float32, -bound, bound)
        b = jax.random.uniform(kb, (fan_out,), jnp.float32, -bound, bound)
        return w, b

    w1, b1 = linear(ks[0], ks[1], state_dim, hidden_dim)
    w2, b2 = linear(ks[2], ks[3], hidden_dim, hidden_dim)
    w3, b3 = linear(ks[4], ks[5], hidden_dim, action_dim)
    return {"w1": w1, "b1": b1, "w2": w2, "b2": b2, "w3": w3, "b3": b3}


def dqn_reference(x, p):
    h = jnp.maximum(x @ p["w1"].T + p["b1"], 0.0)
    h = jnp.maximum(h @ p["w2"].T + p["b2"], 0.0)
    return h @ p["w3"].T + p["b3"]


if __name__ == "__main__":
    # Flappy-bird-ish sizes: state_dim=12, action_dim=2 (flap / no-flap), hidden=128.
    batch, state_dim, action_dim, hidden_dim = 8, 12, 2, 128

    key = jax.random.PRNGKey(0)
    kx, kp = jax.random.split(key)
    x = jax.random.normal(kx, (batch, state_dim), jnp.float32)
    params = init_params(kp, state_dim, action_dim, hidden_dim)

    prep = prepare_params(params)          # one-time weight prep (transpose/cast/pad)
    out = dqn_forward(x, prep)
    out = jax.block_until_ready(out)

    ref = dqn_reference(x, params)         # f32 reference
    assert out.shape == (batch, action_dim)
    # bf16 matmul operands + bf16 output store with f32 accumulation -> loosened tolerance.
    assert jnp.allclose(out, ref, atol=5e-2, rtol=5e-2), "mismatch vs reference"

    print("KERNEL_OK")
</pallas_src>

<mosaic_0001>
module attributes {stable_mosaic.version = 11 : i64} {
  func.func @dqn_kernel(%arg0: i32, %arg1: memref<8x12xf32, #tpu.memory_space<vmem>>, %arg2: memref<12x128xbf16, #tpu.memory_space<vmem>>, %arg3: memref<1x128xf32, #tpu.memory_space<vmem>>, %arg4: memref<128x128xbf16, #tpu.memory_space<vmem>>, %arg5: memref<1x128xf32, #tpu.memory_space<vmem>>, %arg6: memref<128x128xbf16, #tpu.memory_space<vmem>>, %arg7: memref<1x128xf32, #tpu.memory_space<vmem>>, %arg8: memref<8x128xbf16, #tpu.memory_space<vmem>>) attributes {dimension_semantics = [#tpu.dimension_semantics<parallel>], iteration_bounds = array<i64: 1>, scalar_prefetch = 0 : i64, scratch_operands = 0 : i64, tpu.core_type = #tpu.core_type<tc>, window_params = [{transform_indices = @transform_0, window_bounds = array<i64: 8, 12>}, {pipeline_mode = #tpu.pipeline_mode<synchronous>, transform_indices = @transform_1, window_bounds = array<i64: 12, 128>}, {pipeline_mode = #tpu.pipeline_mode<synchronous>, transform_indices = @transform_2, window_bounds = array<i64: 1, 128>}, {pipeline_mode = #tpu.pipeline_mode<synchronous>, transform_indices = @transform_3, window_bounds = array<i64: 128, 128>}, {pipeline_mode = #tpu.pipeline_mode<synchronous>, transform_indices = @transform_4, window_bounds = array<i64: 1, 128>}, {pipeline_mode = #tpu.pipeline_mode<synchronous>, transform_indices = @transform_5, window_bounds = array<i64: 128, 128>}, {pipeline_mode = #tpu.pipeline_mode<synchronous>, transform_indices = @transform_6, window_bounds = array<i64: 1, 128>}, {transform_indices = @transform_7, window_bounds = array<i64: 8, 128>}]} {
    %c0 = arith.constant 0 : index
    %c0_0 = arith.constant 0 : index
    %0 = vector.load %arg1[%c0, %c0_0] : memref<8x12xf32, #tpu.memory_space<vmem>>, vector<8x12xf32>
    %1 = arith.truncf %0 : vector<8x12xf32> to vector<8x12xbf16>
    %c0_1 = arith.constant 0 : index
    %c0_2 = arith.constant 0 : index
    %2 = vector.load %arg2[%c0_1, %c0_2] : memref<12x128xbf16, #tpu.memory_space<vmem>>, vector<12x128xbf16>
    %cst = arith.constant dense<0.000000e+00> : vector<8x128xf32>
    %3 = tpu.matmul %1, %2, %cst {dimension_numbers = #tpu.dot_dimension_numbers<[1], [0], [0], [1], [0, 0, 1, 1], [], []>} : vector<8x12xbf16>, vector<12x128xbf16>, vector<8x128xf32> -> vector<8x128xf32>
    %c0_3 = arith.constant 0 : index
    %c0_4 = arith.constant 0 : index
    %4 = vector.load %arg3[%c0_3, %c0_4] : memref<1x128xf32, #tpu.memory_space<vmem>>, vector<1x128xf32>
    %5 = vector.broadcast %4 : vector<1x128xf32> to vector<8x128xf32>
    %6 = arith.addf %3, %5 : vector<8x128xf32>
    %cst_5 = arith.constant 0.000000e+00 : f32
    %7 = vector.broadcast %cst_5 : f32 to vector<8x128xf32>
    %8 = arith.maximumf %6, %7 : vector<8x128xf32>
    %9 = arith.truncf %8 : vector<8x128xf32> to vector<8x128xbf16>
    %c0_6 = arith.constant 0 : index
    %c0_7 = arith.constant 0 : index
    %10 = vector.load %arg4[%c0_6, %c0_7] : memref<128x128xbf16, #tpu.memory_space<vmem>>, vector<128x128xbf16>
    %cst_8 = arith.constant dense<0.000000e+00> : vector<8x128xf32>
    %11 = tpu.matmul %9, %10, %cst_8 {dimension_numbers = #tpu.dot_dimension_numbers<[1], [0], [0], [1], [0, 0, 1, 1], [], []>} : vector<8x128xbf16>, vector<128x128xbf16>, vector<8x128xf32> -> vector<8x128xf32>
    %c0_9 = arith.constant 0 : index
    %c0_10 = arith.constant 0 : index
    %12 = vector.load %arg5[%c0_9, %c0_10] : memref<1x128xf32, #tpu.memory_space<vmem>>, vector<1x128xf32>
    %13 = vector.broadcast %12 : vector<1x128xf32> to vector<8x128xf32>
    %14 = arith.addf %11, %13 : vector<8x128xf32>
    %cst_11 = arith.constant 0.000000e+00 : f32
    %15 = vector.broadcast %cst_11 : f32 to vector<8x128xf32>
    %16 = arith.maximumf %14, %15 : vector<8x128xf32>
    %17 = arith.truncf %16 : vector<8x128xf32> to vector<8x128xbf16>
    %c0_12 = arith.constant 0 : index
    %c0_13 = arith.constant 0 : index
    %18 = vector.load %arg6[%c0_12, %c0_13] : memref<128x128xbf16, #tpu.memory_space<vmem>>, vector<128x128xbf16>
    %cst_14 = arith.constant dense<0.000000e+00> : vector<8x128xf32>
    %19 = tpu.matmul %17, %18, %cst_14 {dimension_numbers = #tpu.dot_dimension_numbers<[1], [0], [0], [1], [0, 0, 1, 1], [], []>} : vector<8x128xbf16>, vector<128x128xbf16>, vector<8x128xf32> -> vector<8x128xf32>
    %c0_15 = arith.constant 0 : index
    %c0_16 = arith.constant 0 : index
    %20 = vector.load %arg7[%c0_15, %c0_16] : memref<1x128xf32, #tpu.memory_space<vmem>>, vector<1x128xf32>
    %21 = vector.broadcast %20 : vector<1x128xf32> to vector<8x128xf32>
    %22 = arith.addf %19, %21 : vector<8x128xf32>
    %23 = arith.truncf %22 : vector<8x128xf32> to vector<8x128xbf16>
    %c0_17 = arith.constant 0 : index
    %c0_18 = arith.constant 0 : index
    %24 = vector.load %arg8[%c0_17, %c0_18] : memref<8x128xbf16, #tpu.memory_space<vmem>>, vector<8x128xbf16>
    tpu.vector_store %arg8[%c0_17, %c0_18], %23 {strides = array<i32>} : memref<8x128xbf16, #tpu.memory_space<vmem>>, vector<8x128xbf16>,
    return
  }
  func.func @transform_0(%arg0: i32) -> (i32, i32) {
    %c0_i32 = arith.constant 0 : i32
    %c0_i32_0 = arith.constant 0 : i32
    return %arg0, %c0_i32 : i32, i32
  }
  func.func @transform_1(%arg0: i32) -> (i32, i32) {
    %c0_i32 = arith.constant 0 : i32
    %c0_i32_0 = arith.constant 0 : i32
    %c0_i32_1 = arith.constant 0 : i32
    return %c0_i32, %c0_i32_0 : i32, i32
  }
  func.func @transform_2(%arg0: i32) -> (i32, i32) {
    %c0_i32 = arith.constant 0 : i32
    %c0_i32_0 = arith.constant 0 : i32
    %c0_i32_1 = arith.constant 0 : i32
    return %c0_i32, %c0_i32_0 : i32, i32
  }
  func.func @transform_3(%arg0: i32) -> (i32, i32) {
    %c0_i32 = arith.constant 0 : i32
    %c0_i32_0 = arith.constant 0 : i32
    %c0_i32_1 = arith.constant 0 : i32
    return %c0_i32, %c0_i32_0 : i32, i32
  }
  func.func @transform_4(%arg0: i32) -> (i32, i32) {
    %c0_i32 = arith.constant 0 : i32
    %c0_i32_0 = arith.constant 0 : i32
    %c0_i32_1 = arith.constant 0 : i32
    return %c0_i32, %c0_i32_0 : i32, i32
  }
  func.func @transform_5(%arg0: i32) -> (i32, i32) {
    %c0_i32 = arith.constant 0 : i32
    %c0_i32_0 = arith.constant 0 : i32
    %c0_i32_1 = arith.constant 0 : i32
    return %c0_i32, %c0_i32_0 : i32, i32
  }
  func.func @transform_6(%arg0: i32) -> (i32, i32) {
    %c0_i32 = arith.constant 0 : i32
    %c0_i32_0 = arith.constant 0 : i32
    %c0_i32_1 = arith.constant 0 : i32
    return %c0_i32, %c0_i32_0 : i32, i32
  }
  func.func @transform_7(%arg0: i32) -> (i32, i32) {
    %c0_i32 = arith.constant 0 : i32
    %c0_i32_0 = arith.constant 0 : i32
    return %arg0, %c0_i32 : i32, i32
  }
}

</mosaic_0001>

<bundles_post_ra>
// kernel: tpu_custom_call.1
= control target key start
LH: loop header
LB: loop body
LE: loop exit
PB: predicated region body
PF: predicated region fallthrough
CT: control target
= control target key end

     0   :  { %12 = vsyncpa [#allocation3], 0  ;;  %s771_s0 = inlined_call_operand.hbm [shape: f32[8,12], index: 0, kind: input, shape index: {}]   ;;  %s772_s1 = inlined_call_operand.hbm [shape: bf16[12,128], index: 1, kind: input, shape index: {}]   ;;  %s773_s2 = inlined_call_operand.vmem [shape: f32[1,128], index: 2, kind: input, shape index: {}]   ;;  %s774_s3 = inlined_call_operand.hbm [shape: bf16[128,128], index: 3, kind: input, shape index: {}]   ;;  %s775_s4 = inlined_call_operand.vmem [shape: f32[1,128], index: 4, kind: input, shape index: {}]   ;;  %s776_s5 = inlined_call_operand.hbm [shape: bf16[128,128], index: 5, kind: input, shape index: {}]   ;;  %s777_s6 = inlined_call_operand.vmem [shape: f32[1,128], index: 6, kind: input, shape index: {}]   ;;  %s778_s7 = inlined_call_operand.hbm [shape: bf16[8,128], index: 7, kind: output, shape index: {}]  }
   0x1   :  { %13 = vsyncpa [#allocation6], 0 }
   0x2   :  { %14 = vsyncpa [#allocation9], 0 }
   0x3   :  { %15 = vsyncpa [#allocation4], 0  ;;  %s621_s24 = smov [#allocation5]   ;;  %s503_s28 = scalar_lea.hbm %s772_s1, 128 }
   0x4   :  { %s31_s25 = sshll.u32 %s621_s24, 4  ;;  %p504_p0 = scmp.ne.s32.totalorder %s772_s1, %s503_s28  ;;  %s32_s25 = int_to_ptr.vmem [resolvable:$true] %s31_s25 }
   0x5   :  { %p507_p1 = scmp.lt.u32.totalorder %s503_s28, %s772_s1 }
   0x7   :  { %p509_p2 = pnand %p507_p1, %p504_p0 }
   0x9   :  { %512 = shalt.err (!%p509_p2)
}
   0xa   :  { %s513_s10 = scalar_lea.vmem %s32_s25, 128  ;;  %p518_p4 = scmp.lt.s32.totalorder %s32_s25, %s32_s25 }
   0xb   :  { %p514_p3 = scmp.ne.s32.totalorder %s32_s25, %s513_s10  ;;  %p519_p5 = scmp.lt.s32.totalorder %s513_s10, %s513_s10 }
   0xd   :  { %p520_p6 = por %p519_p5, %p518_p4 }
   0xf   :  { %p521_p7 = pnand %p520_p6, %p514_p3 }
  0x11   :  { %524 = shalt.err (!%p521_p7)
}
  0x12   :  { %s622_s11 = smov 64   ;;  %s623_s12 = smov 4  }
  0x13   :  { %37 = dma.hbm_to_vmem [thread:$0]  %s772_s1, 128, %s32_s25, [#allocation6], %s622_s11, %s622_s11, %s623_s12  }
  0x14   :  { %s624_s15 = smov [#allocation2]   ;;  %s625_s17 = smov [#allocation7]  }
  0x15   :  { %s22_s16 = sshll.u32 %s624_s15, 4  ;;  %s45_s18 = sshll.u32 %s625_s17, 4  ;;  %s23_s16 = int_to_ptr.vmem [resolvable:$true] %s22_s16  ;;  %s46_s18 = int_to_ptr.vmem [resolvable:$true] %s45_s18 }
  0x16   :  { %s525_s21 = scalar_lea.hbm %s771_s0, 128 }
  0x17   :  { %p526_p8 = scmp.ne.s32.totalorder %s771_s0, %s525_s21  ;;  %p529_p9 = scmp.lt.u32.totalorder %s525_s21, %s771_s0 }
  0x19   :  { %p531_p10 = pnand %p529_p9, %p526_p8 }
  0x1b   :  { %534 = shalt.err (!%p531_p10)
}
  0x1c   :  { %s535_s1 = scalar_lea.vmem %s23_s16, 128  ;;  %p540_p12 = scmp.lt.s32.totalorder %s23_s16, %s23_s16 }
  0x1d   :  { %p536_p11 = scmp.ne.s32.totalorder %s23_s16, %s535_s1  ;;  %p541_p13 = scmp.lt.s32.totalorder %s535_s1, %s535_s1 }
  0x1f   :  { %p542_p0 = por %p541_p13, %p540_p12 }
  0x21   :  { %p543_p1 = pnand %p542_p0, %p536_p11 }
  0x23   :  { %546 = shalt.err (!%p543_p1)
}
  0x24   :  { %25 = dma.hbm_to_vmem [thread:$0]  %s771_s0, 128, %s23_s16, [#allocation3]  }
  0x25   :  { %s547_s30 = scalar_lea.hbm %s774_s3, 1024 }
  0x26   :  { %p548_p2 = scmp.ne.s32.totalorder %s774_s3, %s547_s30  ;;  %p551_p3 = scmp.lt.u32.totalorder %s547_s30, %s774_s3 }
  0x28   :  { %p553_p4 = pnand %p551_p3, %p548_p2 }
  0x2a   :  { %556 = shalt.err (!%p553_p4)
}
  0x2b   :  { %s557_s14 = scalar_lea.vmem %s46_s18, 1024  ;;  %p562_p6 = scmp.lt.s32.totalorder %s46_s18, %s46_s18 }
  0x2c   :  { %p558_p5 = scmp.ne.s32.totalorder %s46_s18, %s557_s14  ;;  %p563_p7 = scmp.lt.s32.totalorder %s557_s14, %s557_s14 }
  0x2e   :  { %p564_p8 = por %p563_p7, %p562_p6 }
  0x30   :  { %p565_p9 = pnand %p564_p8, %p558_p5 }
  0x32   :  { %568 = shalt.err (!%p565_p9)
}
  0x33   :  { %51 = dma.hbm_to_vmem [thread:$0]  %s774_s3, 1024, %s46_s18, [#allocation6], %s622_s11, %s622_s11, %s623_s12  }
  0x34   :  { %s626_s16 = smov [#allocation8]   ;;  %s569_s21 = scalar_lea.hbm %s776_s5, 1024 }
  0x35   :  { %s59_s17 = sshll.u32 %s626_s16, 4  ;;  %p570_p10 = scmp.ne.s32.totalorder %s776_s5, %s569_s21  ;;  %s60_s17 = int_to_ptr.vmem [resolvable:$true] %s59_s17 }
  0x36   :  { %p573_p11 = scmp.lt.u32.totalorder %s569_s21, %s776_s5 }
  0x38   :  { %p575_p12 = pnand %p573_p11, %p570_p10 }
  0x3a   :  { %578 = shalt.err (!%p575_p12)
}
  0x3b   :  { %s579_s1 = scalar_lea.vmem %s60_s17, 1024  ;;  %p584_p0 = scmp.lt.s32.totalorder %s60_s17, %s60_s17 }
  0x3c   :  { %p580_p13 = scmp.ne.s32.totalorder %s60_s17, %s579_s1  ;;  %p585_p1 = scmp.lt.s32.totalorder %s579_s1, %s579_s1 }
  0x3e   :  { %p586_p2 = por %p585_p1, %p584_p0 }
  0x40   :  { %p587_p3 = pnand %p586_p2, %p580_p13 }
  0x42   :  { %590 = shalt.err (!%p587_p3)
}
  0x43   :  { %65 = dma.hbm_to_vmem [thread:$0]  %s776_s5, 1024, %s60_s17, [#allocation9], %s622_s11, %s622_s11, %s623_s12  }
  0x44   :  { %613 = dma.done.wait [#allocation3], 128  }
  0x45   :  { %614 = vsyncadd [#allocation3], 4294967168 }
  0x46   :  { %615 = dma.done.wait [#allocation6], 1152  }
  0x47   :  { %616 = vsyncadd [#allocation6], 4294966144 }
  0x48   :  { %617 = dma.done.wait [#allocation9], 1024  }
  0x49   :  { %618 = vsyncadd [#allocation9], 4294966272  ;;  %v627_v0 = vmov 0.0   ;;  %vm628_vm0 = vmmov 0   ;;  %vm101_vm1 = vcmask 1045504   ;;  %v81_v2 = vld [vmem:[#allocation2] sm:$0xff] }
  0x4a   :  { %431 = vmatprep.subr.bf16.mxu0 %v627_v0  ;;  %433 = vmatprep.mubr.msk.bf16.mxu0 %vm628_vm0, %v627_v0  ;;  %v486_v1 = vld [vmem:[#allocation5] sm:$0x3f]   ;;  %v82_v4 = vpack.c.bf16 %v81_v2, %v81_v2  ;;  %v487_v5 = vld [vmem:[#allocation7] sm:$0xff]   ;;  %vm97_vm2 = vcmask 97280   ;;  %v488_v6 = vld [vmem:[#allocation7 + $0x8] sm:$0xff]   ;;  %s629_s28 = smov [#allocation10]  }
  0x4b   :  { %437 = vmatprep.subr.bf16.mxu1 %v627_v0  ;;  %453 = vmatprep.mubr.msk.bf16.mxu1 %vm628_vm0, %v627_v0  ;;  %v103_v3 = vsel %vm101_vm1, %v486_v1, 0  ;;  %v489_v7 = vld [vmem:[#allocation7 + $0x10] sm:$0xff]   ;;  %v490_v8 = vld [vmem:[#allocation7 + $0x18] sm:$0xff]   ;;  %v491_v9 = vld [vmem:[#allocation7 + $0x20] sm:$0xff]   ;;  %s379_s29 = sshll.u32 %s629_s28, 4  ;;  %s380_s29 = int_to_ptr.vmem [resolvable:$true] %s379_s29 }
  0x4c   :  { %432 = vmatpush3.bf16.msra.mxu0 %v103_v3  ;;  %438 = vmatpush3.bf16.msra.mxu1 %v487_v5  ;;  %v492_v10 = vld [vmem:[#allocation7 + $0x28] sm:$0xff]   ;;  %v493_v11 = vld [vmem:[#allocation7 + $0x30] sm:$0xff]   ;;  %v494_v12 = vld [vmem:[#allocation7 + $0x38] sm:$0xff]   ;;  %p596_p5 = scmp.lt.s32.totalorder %s380_s29, %s380_s29 }
  0x4d   :  { %457 = vmatprep.subr.bf16.mxu0 %v627_v0  ;;  %439 = vmatprep.subr.bf16.mxu1 %v627_v0  ;;  %v495_v13 = vld [vmem:[#allocation8] sm:$0xff]   ;;  %v496_v14 = vld [vmem:[#allocation8 + $0x8] sm:$0xff]   ;;  %v497_v15 = vld [vmem:[#allocation8 + $0x10] sm:$0xff]  }
  0x4e   :  { %v498_v16 = vld [vmem:[#allocation8 + $0x18] sm:$0xff]   ;;  %v499_v17 = vld [vmem:[#allocation8 + $0x20] sm:$0xff]   ;;  %v500_v18 = vld [vmem:[#allocation8 + $0x28] sm:$0xff]  }
  0x4f   :  { %434 = vmatmul.mubr.msk.bf16.vlgmr.msra.gmra.mrb[0].mxu0 %vm97_vm2, %v82_v4  ;;  %v390_v19 = vld [vmem:[%s773_s2] ss:$0 sm:$0xff]  ;;  %v502_v28 = vld [vmem:[#allocation8 + $0x38] sm:$0xff]  }
  0x50   :  { %473 = vmatprep.mubr.msk.bf16.mxu0 %vm628_vm0, %v627_v0  ;;  %440 = vmatpush3.bf16.msra.mxu1 %v488_v6  ;;  %v501_v27 = vld [vmem:[#allocation8 + $0x30] sm:$0xff]  }
  0x51   :  { %441 = vmatprep.subr.bf16.mxu1 %v627_v0  ;;  %458 = vmatpush3.bf16.msra.mxu0 %v495_v13  ;;  %v393_v29 = vld [vmem:[%s775_s4] ss:$0 sm:$0xff]  ;;  %s591_s4 = scalar_lea.vmem %s380_s29, 64 }
  0x52   :  { %459 = vmatprep.subr.bf16.mxu0 %v627_v0  ;;  %v402_v37 = vld [vmem:[%s777_s6] ss:$0 sm:$0xff]  ;;  %p592_p4 = scmp.ne.s32.totalorder %s380_s29, %s591_s4  ;;  %p597_p6 = scmp.lt.s32.totalorder %s591_s4, %s591_s4 }
  0x54   :  { %442 = vmatpush3.bf16.msra.mxu1 %v489_v7  ;;  %p598_p7 = por %p597_p6, %p596_p5 }
  0x55   :  { %443 = vmatprep.subr.bf16.mxu1 %v627_v0  ;;  %460 = vmatpush3.bf16.msra.mxu0 %v496_v14 }
  0x56   :  { %461 = vmatprep.subr.bf16.mxu0 %v627_v0  ;;  %p599_p8 = pnand %p598_p7, %p592_p4 }
  0x58   :  { %444 = vmatpush3.bf16.msra.mxu1 %v490_v8 }
  0x59   :  { %445 = vmatprep.subr.bf16.mxu1 %v627_v0  ;;  %462 = vmatpush3.bf16.msra.mxu0 %v497_v15 }
  0x5a   :  { %463 = vmatprep.subr.bf16.mxu0 %v627_v0 }
  0x5c   :  { %446 = vmatpush3.bf16.msra.mxu1 %v491_v9 }
  0x5d   :  { %447 = vmatprep.subr.bf16.mxu1 %v627_v0  ;;  %464 = vmatpush3.bf16.msra.mxu0 %v498_v16 }
  0x5e   :  { %465 = vmatprep.subr.bf16.mxu0 %v627_v0 }
  0x60   :  { %448 = vmatpush3.bf16.msra.mxu1 %v492_v10 }
  0x61   :  { %449 = vmatprep.subr.bf16.mxu1 %v627_v0  ;;  %466 = vmatpush3.bf16.msra.mxu0 %v499_v17 }
  0x62   :  { %467 = vmatprep.subr.bf16.mxu0 %v627_v0 }
  0x64   :  { %450 = vmatpush3.bf16.msra.mxu1 %v493_v11 }
  0x65   :  { %451 = vmatprep.subr.bf16.mxu1 %v627_v0  ;;  %468 = vmatpush3.bf16.msra.mxu0 %v500_v18 }
  0x66   :  { %469 = vmatprep.subr.bf16.mxu0 %v627_v0 }
  0x68   :  { %452 = vmatpush3.bf16.msra.mxu1 %v494_v12 }
  0x69   :  { %470 = vmatpush3.bf16.msra.mxu0 %v501_v27 }
  0x6a   :  { %471 = vmatprep.subr.bf16.mxu0 %v627_v0 }
  0x6d   :  { %472 = vmatpush3.bf16.msra.mxu0 %v502_v28 }
 0x122   :  { %v139_v20 = vpop.f32.mrb[0].mxu0 }
 0x123   :  { %v140_v21 = vadd.f32 %v390_v19, %v139_v20  ;;  %v435_v22 = vpop.f32.mrb[1].mxu0 }
 0x124   :  { %v142_v23 = vpop.f32.mrb[2].mxu0 }
 0x125   :  { %v145_v24 = vmax.f32 %v140_v21, 0.0  ;;  %v436_v25 = vpop.f32.mrb[3].mxu0 }
 0x127   :  { %v146_v26 = vpack.c.bf16 %v145_v24, %v145_v24 }
 0x129   :  { %454 = vmatmul.mubr.bf16.vlgmr.msra.gmra.mrb[0].mxu1 %v146_v26 }
 0x1fc   :  { %v252_v30 = vpop.f32.mrb[0].mxu1 }
 0x1fd   :  { %v253_v31 = vadd.f32 %v393_v29, %v252_v30  ;;  %v455_v32 = vpop.f32.mrb[1].mxu1 }
 0x1fe   :  { %v255_v33 = vpop.f32.mrb[2].mxu1 }
 0x1ff   :  { %v258_v34 = vmax.f32 %v253_v31, 0.0  ;;  %v456_v35 = vpop.f32.mrb[3].mxu1 }
 0x201   :  { %v259_v36 = vpack.c.bf16 %v258_v34, %v258_v34 }
 0x203   :  { %474 = vmatmul.mubr.bf16.vlgmr.msra.gmra.mrb[4].mxu0 %v259_v36 }
 0x2d6   :  { %v365_v38 = vpop.f32.mrb[4].mxu0 }
 0x2d7   :  { %v366_v39 = vadd.f32 %v402_v37, %v365_v38  ;;  %v475_v40 = vpop.f32.mrb[5].mxu0 }
 0x2d8   :  { %v368_v41 = vpop.f32.mrb[6].mxu0 }
 0x2d9   :  { %v371_v42 = vpack.c.bf16 %v366_v39, %v366_v39  ;;  %v476_v43 = vpop.f32.mrb[7].mxu0 }
 0x2db   :  { %372 = vst [vmem:[#allocation10] sm:$0xf] %v371_v42 }
 0x2dc   :  { %602 = shalt.err (!%p599_p8)
}
 0x2dd   :  { %s603_s6 = scalar_lea.hbm %s778_s7, 64 }
 0x2de   :  { %p604_p9 = scmp.ne.s32.totalorder %s778_s7, %s603_s6  ;;  %p607_p10 = scmp.lt.u32.totalorder %s603_s6, %s778_s7 }
 0x2e0   :  { %p609_p11 = pnand %p607_p10, %p604_p9 }
 0x2e2   :  { %612 = shalt.err (!%p609_p11)
}
 0x2e3   :  { %382 = dma.vmem_to_hbm [thread:$0]  %s380_s29, 64, %s778_s7, [#allocation4]  }
 0x2e4   :  { %619 = dma.done.wait [#allocation4], 64  }
 0x2e5   :  { %620 = vsyncadd [#allocation4], 4294967232 }
 0x2e6   :  { %386 = vsyncpa [#allocation3], 1 }
 0x2e7   :  { %387 = vsyncpa [#allocation6], 1 }
 0x2e8   :  { %388 = vsyncpa [#allocation9], 1 }
 0x2e9   :  { %389 = vsyncpa [#allocation4], 1 }

</bundles_post_ra>
